<compile_context>
chip_gen: v7x
topology: tpu7x:2x2x1
jax: 0.10.0
libtpu: 0.0.40
codegen_flags: <defaults>
</compile_context>

<pallas_src>
import functools
import math

import jax
import jax.numpy as jnp
from jax import lax
from jax.experimental import pallas as pl
from jax.experimental.pallas import tpu as pltpu


def _graphconv_kernel(adj_ref, x_ref, w1_ref, b1_ref, w2_ref, b2_ref, out_ref, acc_ref):
    """Tiled adj @ x aggregation with the MLP fused into the k==last epilogue."""
    k = pl.program_id(1)

    @pl.when(k == 0)
    def _():
        acc_ref[...] = jnp.zeros_like(acc_ref)

    # Partial aggregation for this K slab: bf16 x bf16 -> f32 accumulate (MXU).
    acc_ref[...] += jnp.dot(adj_ref[...], x_ref[...],
                            preferred_element_type=jnp.float32)

    @pl.when(k == pl.num_programs(1) - 1)
    def _():
        pred = acc_ref[...]                                   # [TM, Din] f32
        h = jnp.dot(pred, w1_ref[...], preferred_element_type=jnp.float32) + b1_ref[...]
        h = jnp.maximum(h, 0.0)                               # bias/relu in f32 (v5e-safe)
        out = jnp.dot(h, w2_ref[...], preferred_element_type=jnp.float32) + b2_ref[...]
        out_ref[...] = out.astype(out_ref.dtype)


def graph_conv(adj_bf16, x_bf16, w1, b1, w2, b2, *, tm=128, tk=128):
    """adj: [N,N] bf16, x: [N,Din] bf16, w1: [Din,H], b1: [1,H], w2: [H,Dout], b2: [1,Dout]."""
    n, din = x_bf16.shape
    hdim = w1.shape[1]
    dout = w2.shape[1]
    assert adj_bf16.shape == (n, n)
    assert n % tm == 0 and n % tk == 0, "pad N to the tile sizes"

    flops = 2 * n * n * din + 2 * n * din * hdim + 2 * n * hdim * dout
    bytes_accessed = (n * n * 2 + n * din * 2
                      + (din * hdim + hdim + hdim * dout + dout) * 4
                      + n * dout * 4)

    return pl.pallas_call(
        _graphconv_kernel,
        out_shape=jax.ShapeDtypeStruct((n, dout), jnp.float32),
        grid=(n // tm, n // tk),
        in_specs=[
            pl.BlockSpec((tm, tk), lambda i, k: (i, k)),       # adj tile
            pl.BlockSpec((tk, din), lambda i, k: (k, 0)),      # x rows for this K slab
            pl.BlockSpec((din, hdim), lambda i, k: (0, 0)),    # W1 (stays resident)
            pl.BlockSpec((1, hdim), lambda i, k: (0, 0)),      # b1
            pl.BlockSpec((hdim, dout), lambda i, k: (0, 0)),   # W2
            pl.BlockSpec((1, dout), lambda i, k: (0, 0)),      # b2
        ],
        out_specs=pl.BlockSpec((tm, dout), lambda i, k: (i, 0)),
        scratch_shapes=[pltpu.VMEM((tm, din), jnp.float32)],
        compiler_params=pltpu.CompilerParams(
            dimension_semantics=("parallel", "arbitrary"),
        ),
        cost_estimate=pl.CostEstimate(
            flops=flops, transcendentals=0, bytes_accessed=bytes_accessed),
    )(adj_bf16, x_bf16, w1, b1, w2, b2)


def _colnorm_kernel(x_ref, o_ref, *, apply_relu):
    """(x - mean_0) / std_0 (unbiased std, matching torch.std), optional ReLU after."""
    x = x_ref[...]
    n = x.shape[0]
    mean = jnp.mean(x, axis=0, keepdims=True)
    centered = x - mean
    var = jnp.sum(centered * centered, axis=0, keepdims=True) / (n - 1)
    out = centered * lax.rsqrt(var)
    if apply_relu:
        out = jnp.maximum(out, 0.0)
    o_ref[...] = out.astype(o_ref.dtype)


def column_normalize(pred, *, apply_relu):
    n, d = pred.shape
    return pl.pallas_call(
        functools.partial(_colnorm_kernel, apply_relu=apply_relu),
        out_shape=jax.ShapeDtypeStruct((n, d), jnp.float32),
    )(pred)


def gcn_forward(x, adj, layer1, layer2, *, tm=128, tk=128):
    """GCN.forward with num_layers=2: conv_first -> ReLU -> conv_last."""
    # TODO(synk): att / mpnn / graphsage branches and normalize_embedding_l2 are
    # disabled under the default GCN config and are not implemented here.
    adj_b = adj.astype(jnp.bfloat16)
    h = graph_conv(adj_b, x.astype(jnp.bfloat16), *layer1, tm=tm, tk=tk)
    h = column_normalize(h, apply_relu=True)    # normalize_embedding + GCN inter-layer ReLU
    h = graph_conv(adj_b, h.astype(jnp.bfloat16), *layer2, tm=tm, tk=tk)
    h = column_normalize(h, apply_relu=False)   # no ReLU after conv_last
    return h


def _xavier_uniform(key, fan_in, fan_out, gain):
    # torch.nn.init.xavier_uniform_ on a [fan_out, fan_in] Linear weight, built directly
    # in the transposed [fan_in, fan_out] layout (the bound is symmetric in fan_in/out).
    bound = gain * math.sqrt(6.0 / (fan_in + fan_out))
    return jax.random.uniform(key, (fan_in, fan_out),
                              minval=-bound, maxval=bound, dtype=jnp.float32)


if __name__ == "__main__":
    key = jax.random.PRNGKey(0)
    k_x, k_adj, k11, k12, k21, k22 = jax.random.split(key, 6)

    # MXU / lane-friendly sizes per perf review: N and feature dims multiples of 128.
    N, INPUT_DIM, HIDDEN_DIM = 256, 128, 128

    x = jax.random.normal(k_x, (N, INPUT_DIM), dtype=jnp.float32)
    adj = (jax.random.uniform(k_adj, (N, N)) < 0.1).astype(jnp.float32)

    gain = math.sqrt(2.0)  # nn.init.calculate_gain('relu')
    layer1 = (
        _xavier_uniform(k11, INPUT_DIM, HIDDEN_DIM, gain),   # conv_first.linear_1.weight^T
        jnp.zeros((1, HIDDEN_DIM), jnp.float32),             # conv_first.linear_1.bias
        _xavier_uniform(k12, HIDDEN_DIM, HIDDEN_DIM, gain),  # conv_first.linear_2.weight^T
        jnp.zeros((1, HIDDEN_DIM), jnp.float32),             # conv_first.linear_2.bias
    )
    layer2 = (
        _xavier_uniform(k21, HIDDEN_DIM, HIDDEN_DIM, gain),  # conv_last.linear_1.weight^T
        jnp.zeros((1, HIDDEN_DIM), jnp.float32),
        _xavier_uniform(k22, HIDDEN_DIM, HIDDEN_DIM, gain),  # conv_last.linear_2.weight^T
        jnp.zeros((1, HIDDEN_DIM), jnp.float32),
    )

    out = jax.block_until_ready(gcn_forward(x, adj, layer1, layer2))

    # Plain-JAX reference of the same math (same bf16 casts for adj / x).
    def ref_layer(xf, adjf, w1, b1, w2, b2, relu_after):
        pred = jnp.dot(adjf.astype(jnp.bfloat16), xf.astype(jnp.bfloat16),
                       preferred_element_type=jnp.float32)
        h = jnp.maximum(pred @ w1 + b1, 0.0)
        o = h @ w2 + b2
        mu = jnp.mean(o, axis=0, keepdims=True)
        std = jnp.sqrt(jnp.sum((o - mu) ** 2, axis=0, keepdims=True) / (o.shape[0] - 1))
        o = (o - mu) / std
        return jnp.maximum(o, 0.0) if relu_after else o

    ref = ref_layer(x, adj, *layer1, True)
    ref = ref_layer(ref, adj, *layer2, False)

    assert out.shape == (N, HIDDEN_DIM)
    max_err = float(jnp.max(jnp.abs(out - ref)))
    assert jnp.allclose(out, ref, atol=3e-2, rtol=3e-2), f"max abs err {max_err}"

    print("KERNEL_OK")
</pallas_src>

<mosaic_0001>
module attributes {stable_mosaic.version = 11 : i64} {
  func.func @_graphconv_kernel(%arg0: i32, %arg1: i32, %arg2: memref<128x128xbf16, #tpu.memory_space<vmem>>, %arg3: memref<128x128xbf16, #tpu.memory_space<vmem>>, %arg4: memref<128x128xf32, #tpu.memory_space<vmem>>, %arg5: memref<1x128xf32, #tpu.memory_space<vmem>>, %arg6: memref<128x128xf32, #tpu.memory_space<vmem>>, %arg7: memref<1x128xf32, #tpu.memory_space<vmem>>, %arg8: memref<128x128xf32, #tpu.memory_space<vmem>>, %arg9: memref<128x128xf32, #tpu.memory_space<vmem>>) attributes {dimension_semantics = [#tpu.dimension_semantics<parallel>, #tpu.dimension_semantics<arbitrary>], iteration_bounds = array<i64: 2, 2>, scalar_prefetch = 0 : i64, scratch_operands = 1 : i64, tpu.core_type = #tpu.core_type<tc>, window_params = [{transform_indices = @transform_0, window_bounds = array<i64: 128, 128>}, {transform_indices = @transform_1, window_bounds = array<i64: 128, 128>}, {pipeline_mode = #tpu.pipeline_mode<synchronous>, transform_indices = @transform_2, window_bounds = array<i64: 128, 128>}, {pipeline_mode = #tpu.pipeline_mode<synchronous>, transform_indices = @transform_3, window_bounds = array<i64: 1, 128>}, {pipeline_mode = #tpu.pipeline_mode<synchronous>, transform_indices = @transform_4, window_bounds = array<i64: 128, 128>}, {pipeline_mode = #tpu.pipeline_mode<synchronous>, transform_indices = @transform_5, window_bounds = array<i64: 1, 128>}, {transform_indices = @transform_6, window_bounds = array<i64: 128, 128>}]} {
    %c0_i32 = arith.constant 0 : i32
    %0 = arith.cmpi eq, %arg1, %c0_i32 : i32
    %1 = arith.extui %0 : i1 to i32
    %c0_i32_0 = arith.constant 0 : i32
    %2 = arith.cmpi ne, %1, %c0_i32_0 : i32
    scf.if %2 {
      %cst_9 = arith.constant 0.000000e+00 : f32
      %12 = vector.broadcast %cst_9 : f32 to vector<128x128xf32>
      %c0_10 = arith.constant 0 : index
      %c0_11 = arith.constant 0 : index
      %13 = vector.load %arg9[%c0_10, %c0_11] : memref<128x128xf32, #tpu.memory_space<vmem>>, vector<128x128xf32>
      tpu.vector_store %arg9[%c0_10, %c0_11], %12 {strides = array<i32>} : memref<128x128xf32, #tpu.memory_space<vmem>>, vector<128x128xf32>,
    } else {
    }
    %c0 = arith.constant 0 : index
    %c0_1 = arith.constant 0 : index
    %3 = vector.load %arg9[%c0, %c0_1] : memref<128x128xf32, #tpu.memory_space<vmem>>, vector<128x128xf32>
    %c0_2 = arith.constant 0 : index
    %c0_3 = arith.constant 0 : index
    %4 = vector.load %arg2[%c0_2, %c0_3] : memref<128x128xbf16, #tpu.memory_space<vmem>>, vector<128x128xbf16>
    %c0_4 = arith.constant 0 : index
    %c0_5 = arith.constant 0 : index
    %5 = vector.load %arg3[%c0_4, %c0_5] : memref<128x128xbf16, #tpu.memory_space<vmem>>, vector<128x128xbf16>
    %cst = arith.constant dense<0.000000e+00> : vector<128x128xf32>
    %6 = tpu.matmul %4, %5, %cst {dimension_numbers = #tpu.dot_dimension_numbers<[1], [0], [0], [1], [0, 0, 1, 1], [], []>} : vector<128x128xbf16>, vector<128x128xbf16>, vector<128x128xf32> -> vector<128x128xf32>
    %7 = arith.addf %3, %6 : vector<128x128xf32>
    %c0_6 = arith.constant 0 : index
    %c0_7 = arith.constant 0 : index
    %8 = vector.load %arg9[%c0_6, %c0_7] : memref<128x128xf32, #tpu.memory_space<vmem>>, vector<128x128xf32>
    tpu.vector_store %arg9[%c0_6, %c0_7], %7 {strides = array<i32>} : memref<128x128xf32, #tpu.memory_space<vmem>>, vector<128x128xf32>,
    %c1_i32 = arith.constant 1 : i32
    %9 = arith.cmpi eq, %arg1, %c1_i32 : i32
    %10 = arith.extui %9 : i1 to i32
    %c0_i32_8 = arith.constant 0 : i32
    %11 = arith.cmpi ne, %10, %c0_i32_8 : i32
    scf.if %11 {
      %c0_9 = arith.constant 0 : index
      %c0_10 = arith.constant 0 : index
      %12 = vector.load %arg9[%c0_9, %c0_10] : memref<128x128xf32, #tpu.memory_space<vmem>>, vector<128x128xf32>
      %c0_11 = arith.constant 0 : index
      %c0_12 = arith.constant 0 : index
      %13 = vector.load %arg4[%c0_11, %c0_12] : memref<128x128xf32, #tpu.memory_space<vmem>>, vector<128x128xf32>
      %cst_13 = arith.constant dense<0.000000e+00> : vector<128x128xf32>
      %14 = tpu.matmul %12, %13, %cst_13 {dimension_numbers = #tpu.dot_dimension_numbers<[1], [0], [0], [1], [0, 0, 1, 1], [], []>} : vector<128x128xf32>, vector<128x128xf32>, vector<128x128xf32> -> vector<128x128xf32>
      %c0_14 = arith.constant 0 : index
      %c0_15 = arith.constant 0 : index
      %15 = vector.load %arg5[%c0_14, %c0_15] : memref<1x128xf32, #tpu.memory_space<vmem>>, vector<1x128xf32>
      %16 = vector.broadcast %15 : vector<1x128xf32> to vector<128x128xf32>
      %17 = arith.addf %14, %16 : vector<128x128xf32>
      %cst_16 = arith.constant 0.000000e+00 : f32
      %18 = vector.broadcast %cst_16 : f32 to vector<128x128xf32>
      %19 = arith.maximumf %17, %18 : vector<128x128xf32>
      %c0_17 = arith.constant 0 : index
      %c0_18 = arith.constant 0 : index
      %20 = vector.load %arg6[%c0_17, %c0_18] : memref<128x128xf32, #tpu.memory_space<vmem>>, vector<128x128xf32>
      %cst_19 = arith.constant dense<0.000000e+00> : vector<128x128xf32>
      %21 = tpu.matmul %19, %20, %cst_19 {dimension_numbers = #tpu.dot_dimension_numbers<[1], [0], [0], [1], [0, 0, 1, 1], [], []>} : vector<128x128xf32>, vector<128x128xf32>, vector<128x128xf32> -> vector<128x128xf32>
      %c0_20 = arith.constant 0 : index
      %c0_21 = arith.constant 0 : index
      %22 = vector.load %arg7[%c0_20, %c0_21] : memref<1x128xf32, #tpu.memory_space<vmem>>, vector<1x128xf32>
      %23 = vector.broadcast %22 : vector<1x128xf32> to vector<128x128xf32>
      %24 = arith.addf %21, %23 : vector<128x128xf32>
      %c0_22 = arith.constant 0 : index
      %c0_23 = arith.constant 0 : index
      %25 = vector.load %arg8[%c0_22, %c0_23] : memref<128x128xf32, #tpu.memory_space<vmem>>, vector<128x128xf32>
      tpu.vector_store %arg8[%c0_22, %c0_23], %24 {strides = array<i32>} : memref<128x128xf32, #tpu.memory_space<vmem>>, vector<128x128xf32>,
    } else {
    }
    return
  }
  func.func @transform_0(%arg0: i32, %arg1: i32) -> (i32, i32) {
    %c0_i32 = arith.constant 0 : i32
    return %arg0, %arg1 : i32, i32
  }
  func.func @transform_1(%arg0: i32, %arg1: i32) -> (i32, i32) {
    %c0_i32 = arith.constant 0 : i32
    %c0_i32_0 = arith.constant 0 : i32
    return %arg1, %c0_i32 : i32, i32
  }
  func.func @transform_2(%arg0: i32, %arg1: i32) -> (i32, i32) {
    %c0_i32 = arith.constant 0 : i32
    %c0_i32_0 = arith.constant 0 : i32
    %c0_i32_1 = arith.constant 0 : i32
    return %c0_i32, %c0_i32_0 : i32, i32
  }
  func.func @transform_3(%arg0: i32, %arg1: i32) -> (i32, i32) {
    %c0_i32 = arith.constant 0 : i32
    %c0_i32_0 = arith.constant 0 : i32
    %c0_i32_1 = arith.constant 0 : i32
    return %c0_i32, %c0_i32_0 : i32, i32
  }
  func.func @transform_4(%arg0: i32, %arg1: i32) -> (i32, i32) {
    %c0_i32 = arith.constant 0 : i32
    %c0_i32_0 = arith.constant 0 : i32
    %c0_i32_1 = arith.constant 0 : i32
    return %c0_i32, %c0_i32_0 : i32, i32
  }
  func.func @transform_5(%arg0: i32, %arg1: i32) -> (i32, i32) {
    %c0_i32 = arith.constant 0 : i32
    %c0_i32_0 = arith.constant 0 : i32
    %c0_i32_1 = arith.constant 0 : i32
    return %c0_i32, %c0_i32_0 : i32, i32
  }
  func.func @transform_6(%arg0: i32, %arg1: i32) -> (i32, i32) {
    %c0_i32 = arith.constant 0 : i32
    %c0_i32_0 = arith.constant 0 : i32
    return %arg0, %c0_i32 : i32, i32
  }
}

</mosaic_0001>

<bundles_post_ra>
// kernel: tpu_custom_call.1
= control target key start
LH: loop header
LB: loop body
LE: loop exit
PB: predicated region body
PF: predicated region fallthrough
CT: control target
= control target key end

     0   :  { %s2494_s0 = inlined_call_operand.hbm [shape: bf16[256,256], index: 0, kind: input, shape index: {}]   ;;  %s2495_s1 = inlined_call_operand.hbm [shape: bf16[256,128], index: 1, kind: input, shape index: {}]   ;;  %s2496_s2 = inlined_call_operand.hbm [shape: f32[128,128], index: 2, kind: input, shape index: {}]   ;;  %s2497_s3 = inlined_call_operand.vmem [shape: f32[1,128], index: 3, kind: input, shape index: {}]   ;;  %s2498_s4 = inlined_call_operand.hbm [shape: f32[128,128], index: 4, kind: input, shape index: {}]   ;;  %s2499_s5 = inlined_call_operand.vmem [shape: f32[1,128], index: 5, kind: input, shape index: {}]   ;;  %s2500_s6 = inlined_call_operand.hbm [shape: f32[256,128], index: 6, kind: output, shape index: {}]  }
   0x1   :  { %2521 = sst [smem:[#allocation26_spill]] %s2494_s0 }
   0x2   :  { %2522 = sst [smem:[#allocation27_spill]] %s2496_s2 }
   0x3   :  { %2523 = sst [smem:[#allocation28_spill]] %s2497_s3 }
   0x4   :  { %2524 = sst [smem:[#allocation29_spill]] %s2498_s4 }
   0x5   :  { %2525 = sst [smem:[#allocation30_spill]] %s2499_s5 }
   0x6   :  { %2526 = sst [smem:[#allocation31_spill]] %s2500_s6 }
   0x7   :  { %11 = vsyncpa [#allocation4], 0 }
   0x8   :  { %13 = vsyncpa [#allocation4 + $0x1], 0 }
   0x9   :  { %14 = vsyncpa [#allocation7], 0 }
   0xa   :  { %16 = vsyncpa [#allocation7 + $0x1], 0 }
   0xb   :  { %17 = vsyncpa [#allocation10], 0 }
   0xc   :  { %18 = vsyncpa [#allocation5], 0 }
   0xd   :  { %20 = vsyncpa [#allocation5 + $0x1], 0  ;;  %s2031_s21 = smov 0   ;;  %s2033_s22 = smov 0  }
   0xe   :  { %s2035_s23 = smov 0   ;;  %s2037_s24 = smov 0  }
   0xf   :  { %s2039_s25 = smov 0   ;;  %s2041_s26 = smov 0  }
  0x10   :  { %s2043_s27 = smov 0   ;;  %s2045_s28 = smov 0  }
  0x11   :  { %s2047_s29 = smov 0   ;;  %s2049_s30 = smov 0  }
  0x12   :  { %s2051_s7 = smov 0   ;;  %s2053_s8 = smov 0  }
  0x13   :  { %s2055_s9 = smov 0   ;;  %s2057_s10 = smov 0  }
  0x14 LB: > { %2527 = sst [smem:[#allocation17_spill]] %s1930_s21  ;;  %s2098_s11 = sadd.s32 4294967295, %s1982_s10   ;;  %s1982_s10 = sphi %s2057_s10, %s26_s10   ;;  %s1978_s9 = sphi %s2055_s9, %s2590_s9   ;;  %s1974_s8 = sphi %s2053_s8, %s2589_s8   ;;  %s1970_s7 = sphi %s2051_s7, %s2588_s7   ;;  %s1966_s30 = sphi %s2049_s30, %s2587_s30   ;;  %s1962_s29 = sphi %s2047_s29, %s2586_s29   ;;  %s1958_s28 = sphi %s2045_s28, %s2585_s28   ;;  %s1954_s27 = sphi %s2043_s27, %s2584_s27   ;;  %s1950_s26 = sphi %s2041_s26, %s2583_s26   ;;  %s1946_s25 = sphi %s2039_s25, %s2582_s25   ;;  %s1942_s24 = sphi %s2037_s24, %s2581_s24   ;;  %s1938_s23 = sphi %s2035_s23, %s2580_s23   ;;  %s1934_s22 = sphi %s2033_s22, %s2579_s22   ;;  %s1930_s21 = sphi %s2031_s21, %s2575_s21  }
  0x15   : > { %2528 = sst [smem:[#allocation18_spill]] %s1934_s22  ;;  %s1183_s12 = sadd.s32 4294967294, %s1982_s10  }
  0x16   : > { %2529 = sst [smem:[#allocation19_spill]] %s1966_s30  ;;  %p60_p0 = scmp.ne.s32.totalorder %s1958_s28, %s1954_s27 }
  0x17   : > { %2530 = sst [smem:[#allocation20_spill]] %s1970_s7  ;;  %p2506_p1 = scmp.eq.s32.totalorder %s2098_s11, 0 }
  0x18   : > { %2531 = sst [smem:[#allocation21_spill]] %s2098_s11  ;;  %p86_p2 = scmp.ne.s32.totalorder %s1946_s25, %s1942_s24 }
  0x19   : > { %p2107_p3 = por %p2506_p1, %p60_p0  ;;  %p193_p4 = scmp.ne.s32.totalorder %s1938_s23, %s1934_s22 }
  0x1a   : > { %p2115_p5 = por %p86_p2, %p2506_p1  ;;  %p194_p6 = scmp.eq.s32.totalorder %s2098_s11, 3 }
  0x1b   : > { %s2532_s14 = scalar_select %p2107_p3, 1, 0 }
  0x1c   : > { %s2533_s15 = scalar_select %p2115_p5, 1, 0 }
  0x1d   : > { %p199_p7 = scmp.ne.s32.totalorder %s1934_s22, %s1930_s21  ;;  %p200_p8 = scmp.eq.s32.totalorder %s1183_s12, 3 }
  0x1e   : > { %2534 = sst [smem:[#allocation22_spill]] %s2533_s15  ;;  %p2122_p9 = por %p194_p6, %p193_p4 }
  0x1f   : > { %p1184_p10 = scmp.ge.s32.totalorder %s1982_s10, 1  ;;  %p2127_p11 = por %p200_p8, %p199_p7 }
  0x20   : > { %s2535_s16 = scalar_select %p2122_p9, 1, 0 }
  0x21   : > { %s2537_s17 = scalar_select %p2127_p11, 1, 0 }
  0x22   : > { %2536 = sst [smem:[#allocation23_spill]] %s2535_s16  ;;  %p207_p12 = scmp.lt.s32.totalorder %s1982_s10, 5 }
  0x23   : > { %2538 = sst [smem:[#allocation24_spill]] %s2537_s17  ;;  %s1984_s19 = smov [#allocation8]  }
  0x24   : > { %p2132_p13 = pnand %p1184_p10, %p207_p12  ;;  %s219_s20 = sshll.u32 %s1984_s19, 4  ;;  %s220_s20 = int_to_ptr.vmem [resolvable:$true] %s219_s20 }
  0x25   : > { %s1985_s27 = smov [#allocation9]   ;;  %s2541_s2 = sld [smem:[#allocation27_spill]] }
  0x26   : > { %s2539_s18 = scalar_select %p2132_p13, 1, 0 }
  0x27   : > { %p1547_p0 = pneg %p2132_p13  ;;  %s235_s12 = sshll.u32 %s1985_s27, 4  ;;  %s2144_s12 = int_to_ptr.vmem [resolvable:$true] %s235_s12 }
  0x29   : > { %p2140_p2 = pnand %p1547_p0, %p2506_p1 }
  0x2b   : > { %s1708_s21 = scalar_lea.hbm %s2541_s2, 2048  ;;  %p1710_p6 = pneg %p2140_p2 }
  0x2c   : > { %p1709_p4 = scmp.ne.s32.totalorder %s2541_s2, %s1708_s21  ;;  %p1715_p10 = scmp.lt.u32.totalorder %s1708_s21, %s2541_s2 }
  0x2e   : > { %p1711_p7 = pnand %p1710_p6, %p1709_p4 }
  0x30   : > { %p1712_p8 = pneg %p1711_p7 }
  0x32   : > { %p1717_p12 = pnand %p1715_p10, %p1712_p8 }
  0x34   : > { %1720 = shalt.err (!%p1717_p12)
}
  0x35   : > { %s1721_s27 = scalar_lea.vmem %s220_s20, 2048  ;;  %p1729_p9 = scmp.lt.s32.totalorder %s220_s20, %s220_s20 }
  0x36   : > { %p1722_p0 = scmp.ne.s32.totalorder %s220_s20, %s1721_s27  ;;  %p1730_p5 = scmp.lt.s32.totalorder %s1721_s27, %s1721_s27 }
  0x38   : > { %p1724_p1 = pnand %p1722_p0, %p1710_p6  ;;  %p1731_p3 = por %p1730_p5, %p1729_p9 }
  0x3a   : > { %p1725_p11 = pneg %p1724_p1 }
  0x3c   : > { %p1732_p13 = pnand %p1731_p3, %p1725_p11 }
  0x3e   : > { %1735 = shalt.err (!%p1732_p13)
}
  0x3f   : > { %s2511_s6 = smov 128   ;;  %s1987_s13 = smov 8  }
  0x40   : > { %1550 = dma.hbm_to_vmem [thread:$0]  (!%p2140_p2), %s2541_s2, 2048, %s220_s20, [#allocation7], %s2511_s6, %s2511_s6, %s1987_s13  }
  0x41   : > { %s2542_s4 = sld [smem:[#allocation29_spill]] }
  0x47   : > { %s1736_s19 = scalar_lea.hbm %s2542_s4, 2048 }
  0x48   : > { %p1737_p1 = scmp.ne.s32.totalorder %s2542_s4, %s1736_s19  ;;  %p1743_p9 = scmp.lt.u32.totalorder %s1736_s19, %s2542_s4 }
  0x4a   : > { %p1739_p3 = pnand %p1737_p1, %p1710_p6 }
  0x4c   : > { %p1740_p5 = pneg %p1739_p3 }
  0x4e   : > { %p1745_p11 = pnand %p1743_p9, %p1740_p5 }
  0x50   : > { %1748 = shalt.err (!%p1745_p11)
}
  0x51   : > { %s1749_s20 = scalar_lea.vmem %s2144_s12, 2048  ;;  %p1757_p8 = scmp.lt.s32.totalorder %s2144_s12, %s2144_s12 }
  0x52   : > { %p1750_p13 = scmp.ne.s32.totalorder %s2144_s12, %s1749_s20  ;;  %p1758_p10 = scmp.lt.s32.totalorder %s1749_s20, %s1749_s20 }
  0x54   : > { %p1752_p4 = pnand %p1750_p13, %p1710_p6  ;;  %p1759_p12 = por %p1758_p10, %p1757_p8 }
  0x56   : > { %p1753_p7 = pneg %p1752_p4 }
  0x58   : > { %p1760_p0 = pnand %p1759_p12, %p1753_p7 }
  0x5a   : > { %1763 = shalt.err (!%p1760_p0)
}
  0x5b   : > { %1553 = dma.hbm_to_vmem [thread:$0]  (!%p2140_p2), %s2542_s4, 2048, %s2144_s12, [#allocation10], %s2511_s6, %s2511_s6, %s1987_s13  }
  0x5c   : > { %s35_s30 = sadd.s32 1, %s1974_s8  ;;  %s38_s24 = sadd.s32 1, %s1978_s9 }
  0x5d   : > { %p36_p6 = scmp.ge.s32.totalorder %s35_s30, 2  ;;  %s47_s21 = sadd.s32 1, %s1962_s29 }
  0x5e   : > { %p54_p1 = scmp.ne.s32.totalorder %s1962_s29, %s1958_s28  ;;  %p2520_p3 = scmp.eq.s32.totalorder %s1982_s10, 0 }
  0x5f   : > { %s2592_s30 = smov (%p36_p6, %s35_s30), 0  ;;  %s2594_s24 = smov (!%p36_p6, %s38_s24), %s1978_s9 }
  0x60   : > { %2543 = sst [smem:[#allocation25_spill]] %s2592_s30  ;;  %s2208_s7 = ssub.s32 %s1974_s8, %s2592_s30 }
  0x61   : > { %p2212_p2 = por %p2520_p3, %p54_p1  ;;  %p40_p5 = scmp.ge.s32.totalorder %s2594_s24, 2 }
  0x62   : > { %p71_p9 = scmp.eq.s32.totalorder %s2208_s7, 0  ;;  %p2519_p11 = scmp.lt.s32.totalorder %s1982_s10, 4 }
  0x63   : > { %s252_s13 = sand.u32 1, %s1962_s29   ;;  %s2596_s24 = smov (%p40_p5, %s2594_s24), 0 }
  0x64   : > { %s1188_s16 = sshll.u32 %s252_s13, 6  ;;  %s42_s17 = ssub.s32 %s1978_s9, %s2596_s24 }
  0x65   : > { %s44_s19 = sor.u32 %s2208_s7, %s42_s17  ;;  %p181_p13 = scmp.eq.s32.totalorder %s42_s17, 0 }
  0x66   : > { %p45_p4 = scmp.eq.s32.totalorder %s44_s19, 0  ;;  %s1226_s27 = sshll.u32 %s1978_s9, 5 }
  0x67   : > { %s2545_s20 = sadd.s32 1, %s1938_s23  ;;  %s262_s6 = sadd.s32 %s1974_s8, %s1226_s27 }
  0x68   : > { %s2228_s3 = scalar_select %p181_p13, %s1938_s23, %s2545_s20  }
  0x69   : > { %s2231_s5 = scalar_select %p45_p4, %s1962_s29, %s47_s21  }
  0x6a   : > { %s256_s2 = scalar_lea.vmem [#allocation3], %s1188_s16  ;;  %s1191_s30 = sshll.u32 %s262_s6, 6 }
  0x6b   : > { %s265_s4 = sshll.u32 %s256_s2, 4  ;;  %s2546_s0 = sld [smem:[#allocation26_spill]]  ;;  %s2234_s4 = int_to_ptr.vmem [resolvable:$true] %s265_s4 }
  0x6c   : > { %p2245_p7 = pnand %p2519_p11, %p2212_p2  ;;  %s2249_s2 = scalar_lea.sflag [#allocation4], %s252_s13 }
  0x6e   : > { %p1766_p10 = pneg %p2245_p7 }
  0x71   : > { %s2239_s11 = scalar_lea.hbm %s2546_s0, %s1191_s30  ;;  %s1769_s30 = scalar_lea.hbm %s2546_s0, 4096 }
  0x72   : > { %s1764_s6 = scalar_lea.hbm %s2239_s11, 1024  ;;  %p1770_p6 = scmp.lt.u32.totalorder %s2239_s11, %s2546_s0 }
  0x73   : > { %p1765_p8 = scmp.ne.s32.totalorder %s2239_s11, %s1764_s6  ;;  %p1771_p1 = scmp.lt.u32.totalorder %s1769_s30, %s1764_s6 }
  0x74   : > { %p1773_p5 = scmp.lt.u32.totalorder %s1764_s6, %s2239_s11 }
  0x75   : > { %p1767_p12 = pnand %p1766_p10, %p1765_p8  ;;  %p1772_p2 = por %p1771_p1, %p1770_p6 }
  0x77   : > { %p1768_p0 = pneg %p1767_p12  ;;  %p1774_p13 = por %p1773_p5, %p1772_p2 }
  0x79   : > { %p1775_p4 = pnand %p1774_p13, %p1768_p0 }
  0x7b   : > { %1778 = shalt.err (!%p1775_p4)
}
  0x7c   : > { %s1779_s13 = scalar_lea.vmem %s2234_s4, 1024  ;;  %s1988_s17 = smov [#allocation3]  }
  0x7d   : > { %p1780_p8 = scmp.ne.s32.totalorder %s2234_s4, %s1779_s13  ;;  %s1784_s19 = sshll.u32 %s1988_s17, 4  ;;  %s1785_s19 = int_to_ptr.vmem [resolvable:$false] %s1784_s19 }
  0x7e   : > { %s1786_s27 = scalar_lea.vmem %s1785_s19, 2048  ;;  %p1787_p3 = scmp.lt.s32.totalorder %s2234_s4, %s1785_s19 }
  0x7f   : > { %p1782_p12 = pnand %p1780_p8, %p1766_p10  ;;  %p1788_p6 = scmp.lt.s32.totalorder %s1786_s27, %s1779_s13 }
  0x81   : > { %p1783_p11 = pneg %p1782_p12  ;;  %p1789_p1 = por %p1788_p6, %p1787_p3 }
  0x83   : > { %p1790_p2 = pnand %p1789_p1, %p1783_p11 }
  0x85   : > { %1793 = shalt.err (!%p1790_p2)
}
  0x86   : > { %s1989_s20 = smov 64   ;;  %s1990_s6 = smov 4  }
  0x87   : > { %s2548_s22 = smov 128   ;;  %s275_s15 = sand.u32 1, %s1982_s10  }
  0x88   : > { %1557 = dma.hbm_to_vmem [thread:$0]  (!%p2245_p7), %s2239_s11, 1024, %s2234_s4, %s2249_s2, %s2548_s22, %s1989_s20, %s1990_s6  }
  0x89   : > { %s73_s30 = sadd.s32 1, %s1950_s26  ;;  %p80_p3 = scmp.ne.s32.totalorder %s1950_s26, %s1946_s25 }
  0x8a   : > { %s2287_s12 = scalar_select %p71_p9, %s1950_s26, %s73_s30  }
  0x8b   : > { %p2549_p11 = scmp.eq.s32.totalorder %s1982_s10, 0  ;;  %s277_s16 = sand.u32 1, %s1950_s26  }
  0x8c   : > { %s1227_s13 = sshll.u32 %s1974_s8, 10  ;;  %s1192_s17 = sshll.u32 %s277_s16, 6 }
  0x8d   : > { %p82_p10 = por %p80_p3, %p2549_p11  ;;  %s2296_s0 = scalar_lea.hbm %s2495_s1, %s1227_s13 }
  0x8e   : > { %p2550_p0 = scmp.lt.s32.totalorder %s1982_s10, 4  ;;  %s279_s11 = scalar_lea.vmem [#allocation6], %s1192_s17 }
  0x8f   : > { %s286_s7 = sshll.u32 %s279_s11, 4  ;;  %s2306_s21 = scalar_lea.sflag [#allocation7], %s275_s15  ;;  %s2304_s7 = int_to_ptr.vmem [resolvable:$true] %s286_s7 }
  0x90   : > { %p2300_p7 = pnand %p2550_p0, %p82_p10  ;;  %s1794_s2 = scalar_lea.hbm %s2296_s0, 1024 }
  0x91   : > { %p1795_p9 = scmp.ne.s32.totalorder %s2296_s0, %s1794_s2  ;;  %s1799_s16 = scalar_lea.hbm %s2495_s1, 2048 }
  0x92   : > { %p1796_p5 = pneg %p2300_p7  ;;  %p1800_p8 = scmp.lt.u32.totalorder %s2296_s0, %s2495_s1 }
  0x93   : > { %p1801_p12 = scmp.lt.u32.totalorder %s1799_s16, %s1794_s2  ;;  %p1803_p1 = scmp.lt.u32.totalorder %s1794_s2, %s2296_s0 }
  0x94   : > { %p1797_p13 = pnand %p1796_p5, %p1795_p9 }
  0x95   : > { %p1802_p6 = por %p1801_p12, %p1800_p8 }
  0x96   : > { %p1798_p4 = pneg %p1797_p13 }
  0x97   : > { %p1804_p2 = por %p1803_p1, %p1802_p6 }
  0x99   : > { %p1805_p3 = pnand %p1804_p2, %p1798_p4 }
  0x9b   : > { %1808 = shalt.err (!%p1805_p3)
}
  0x9c   : > { %s1809_s15 = scalar_lea.vmem %s2304_s7, 1024  ;;  %s1991_s17 = smov [#allocation6]  }
  0x9d   : > { %p1810_p11 = scmp.ne.s32.totalorder %s2304_s7, %s1809_s15  ;;  %s1814_s27 = sshll.u32 %s1991_s17, 4  ;;  %s1815_s27 = int_to_ptr.vmem [resolvable:$false] %s1814_s27 }
  0x9e   : > { %s1816_s11 = scalar_lea.vmem %s1815_s27, 2048  ;;  %p1817_p9 = scmp.lt.s32.totalorder %s2304_s7, %s1815_s27 }
  0x9f   : > { %p1812_p10 = pnand %p1810_p11, %p1796_p5  ;;  %p1818_p13 = scmp.lt.s32.totalorder %s1816_s11, %s1809_s15 }
  0xa1   : > { %p1813_p0 = pneg %p1812_p10  ;;  %p1819_p8 = por %p1818_p13, %p1817_p9 }
  0xa3   : > { %p1820_p12 = pnand %p1819_p8, %p1813_p0 }
  0xa5   : > { %1823 = shalt.err (!%p1820_p12)
}
  0xa6   : > { %1560 = dma.hbm_to_vmem [thread:$0]  (!%p2300_p7), %s2296_s0, 1024, %s2304_s7, %s2306_s21, %s1989_s20, %s1989_s20, %s1990_s6  }
  0xa7   : > { %p2552_p5 = scmp.ne.s32.totalorder %s2539_s18, 0 }
  0xa8   : > { %s300_s2 = sand.u32 (!%p2552_p5), 1, %s1958_s28   ;;  %p2553_p4 = scmp.ne.s32.totalorder (!%p2552_p5), %s2532_s14, 0 }
  0xa9   : > { %298 = sbr.rel (%p2552_p5) target bundleno = 963 (0x3c3), region = 44  ;;  %s1196_s22 = sshll.u32 (!%p2552_p5), %s300_s2, 6 }
  0xaa   : > { %s301_s30 = scalar_lea.sflag (!%p2552_p5), [#allocation4], %s300_s2  ;;  %s2340_s16 = scalar_lea.vmem (!%p2552_p5), [#allocation3], %s1196_s22 }
  0xb0   : > { %1909 = dma.done.wait (%p2553_p4), %s301_s30, 1024  }
  0xb1   : > { %1911 = vsyncadd (%p2553_p4), %s301_s30, 4294966272  ;;  %s2554_s4 = sld [smem:[#allocation21_spill]]  ;;  %s2555_s13 = sld [smem:[#allocation22_spill]] }
  0xb2   : > { %s311_s0 = sand.u32 1, %s1946_s25  }
  0xb3   : > { %s1197_s20 = sshll.u32 %s311_s0, 6 }
  0xb4   : > { %s2348_s6 = scalar_lea.vmem [#allocation6], %s1197_s20 }
  0xb7   : > { %s309_s19 = sand.u32 1, %s2554_s4   ;;  %p2556_p7 = scmp.ne.s32.totalorder %s2555_s13, 0 }
  0xb8   : > { %s310_s18 = scalar_lea.sflag [#allocation7], %s309_s19 }
  0xb9   : > { %1913 = dma.done.wait (%p2556_p7), %s310_s18, 1024  }
  0xba   : > { %1915 = vsyncadd (%p2556_p7), %s310_s18, 4294966272  ;;  %p2557_p6 = scmp.eq.s32.totalorder %s2554_s4, 0 }
  0xbc   : > { %1917 = dma.done.wait (%p2557_p6), [#allocation7], 2048   ;;  %p2558_p1 = pmov %p2557_p6 }
  0xbe   : > { %1919 = vsyncadd (%p2558_p1), [#allocation7], 4294965248  ;;  %p2559_p2 = pmov %p2558_p1 }
  0xbf   : > { %p2560_p3 = pmov %p2558_p1 }
  0xc0   : > { %1921 = dma.done.wait (%p2559_p2), [#allocation10], 2048  }
  0xc1   : > { %1923 = vsyncadd (%p2560_p3), [#allocation10], 4294965248  ;;  %s2561_s14 = sld [smem:[#allocation18_spill]]  ;;  %s2562_s17 = sld [smem:[#allocation19_spill]] }
  0xc7   : > { %s352_s7 = sand.u32 1, %s2561_s14   ;;  %p1201_p11 = scmp.ne.s32.totalorder %s2562_s17, 0 }
  0xc8   : > { %s1200_s21 = sshll.u32 %s352_s7, 7  ;;  %v1992_v0 = vmov (!%p1201_p11), 0.0  }
  0xc9   : > { %s2365_s15 = scalar_lea.vmem [#allocation11], %s1200_s21  ;;  %362 = sbr.rel (%p1201_p11) target bundleno = 209 (0xd1), region = 64  ;;  %363 = vst [vmem:[#allocation2] sm:$0xff] (!%p1201_p11), %v1992_v0  ;;  %364 = vst [vmem:[#allocation2 + $0x8] sm:$0xff] (!%p1201_p11), %v1992_v0 }
  0xca   : > { %365 = vst [vmem:[#allocation2 + $0x10] sm:$0xff] (!%p1201_p11), %v1992_v0  ;;  %366 = vst [vmem:[#allocation2 + $0x18] sm:$0xff] (!%p1201_p11), %v1992_v0 }
  0xcb   : > { %367 = vst [vmem:[#allocation2 + $0x20] sm:$0xff] (!%p1201_p11), %v1992_v0  ;;  %368 = vst [vmem:[#allocation2 + $0x28] sm:$0xff] (!%p1201_p11), %v1992_v0 }
  0xcc   : > { %369 = vst [vmem:[#allocation2 + $0x30] sm:$0xff] (!%p1201_p11), %v1992_v0  ;;  %370 = vst [vmem:[#allocation2 + $0x38] sm:$0xff] (!%p1201_p11), %v1992_v0 }
  0xcd   : > { %371 = vst [vmem:[#allocation2 + $0x40] sm:$0xff] (!%p1201_p11), %v1992_v0  ;;  %372 = vst [vmem:[#allocation2 + $0x48] sm:$0xff] (!%p1201_p11), %v1992_v0 }
  0xce   : > { %373 = vst [vmem:[#allocation2 + $0x50] sm:$0xff] (!%p1201_p11), %v1992_v0  ;;  %374 = vst [vmem:[#allocation2 + $0x58] sm:$0xff] (!%p1201_p11), %v1992_v0 }
  0xcf   : > { %375 = vst [vmem:[#allocation2 + $0x60] sm:$0xff] (!%p1201_p11), %v1992_v0  ;;  %376 = vst [vmem:[#allocation2 + $0x68] sm:$0xff] (!%p1201_p11), %v1992_v0 }
  0xd0   : > { %377 = vst [vmem:[#allocation2 + $0x70] sm:$0xff] %v1992_v0  ;;  %378 = vst [vmem:[#allocation2 + $0x78] sm:$0xff] %v1992_v0 }
  0xd1 PF: > { %v1692_v1 = vld [vmem:[%s2348_s6] sm:$0xff]   ;;  %v1693_v2 = vld [vmem:[%s2348_s6 + $0x8] sm:$0xff]   ;;  %v1694_v3 = vld [vmem:[%s2348_s6 + $0x10] sm:$0xff]   ;;  %s2563_s27 = sld [smem:[#allocation19_spill]] }
  0xd2   : > { %1309 = vmatprep.subr.bf16.mxu0 %v1692_v1  ;;  %1517 = vmatprep.subr.bf16.mxu1 %v1692_v1  ;;  %v1695_v4 = vld [vmem:[%s2348_s6 + $0x18] sm:$0xff]   ;;  %v1700_v5 = vld [vmem:[%s2340_s16] sm:$0xff]   ;;  %v1697_v8 = vld [vmem:[%s2348_s6 + $0x28] sm:$0xff]  }
  0xd3   : > { %1310 = vmatpush3.bf16.msra.mxu0 %v1692_v1  ;;  %1525 = vmatpush3.bf16.msra.mxu1 %v1692_v1  ;;  %v1701_v6 = vld [vmem:[%s2340_s16 + $0x20] sm:$0xff]   ;;  %v1698_v9 = vld [vmem:[%s2348_s6 + $0x30] sm:$0xff]   ;;  %v1699_v10 = vld [vmem:[%s2348_s6 + $0x38] sm:$0xff]  }
  0xd4   : > { %1311 = vmatprep.subr.bf16.mxu0 %v1693_v2  ;;  %1518 = vmatprep.subr.bf16.mxu1 %v1693_v2  ;;  %v1696_v7 = vld [vmem:[%s2348_s6 + $0x20] sm:$0xff]   ;;  %v1702_v11 = vld [vmem:[%s2340_s16 + $0x8] sm:$0xff]   ;;  %v1704_v13 = vld [vmem:[%s2340_s16 + $0x10] sm:$0xff]  }
  0xd5   : > { %1325 = vmatprep.mubr.bf16.mxu0 %v1700_v5  ;;  %1333 = vmatprep.mubr.bf16.mxu1 %v1701_v6  ;;  %v1703_v12 = vld [vmem:[%s2340_s16 + $0x28] sm:$0xff]   ;;  %v1705_v14 = vld [vmem:[%s2340_s16 + $0x30] sm:$0xff]   ;;  %v1706_v15 = vld [vmem:[%s2340_s16 + $0x18] sm:$0xff]  }
  0xd6   : > { %v1707_v16 = vld [vmem:[%s2340_s16 + $0x38] sm:$0xff]   ;;  %v381_v17 = vld [vmem:[#allocation2 + $0x10] sm:$0xff]  ;;  %v379_v19 = vld [vmem:[#allocation2] sm:$0xff] }
  0xd7   : > { %1312 = vmatpush3.bf16.msra.mxu0 %v1693_v2  ;;  %1526 = vmatpush3.bf16.msra.mxu1 %v1693_v2  ;;  %v389_v18 = vld [vmem:[#allocation2 + $0x50] sm:$0xff]  ;;  %v387_v20 = vld [vmem:[#allocation2 + $0x40] sm:$0xff]  ;;  %v382_v23 = vld [vmem:[#allocation2 + $0x18] sm:$0xff]  ;;  %p1218_p10 = scmp.ne.s32.totalorder %s2563_s27, 1 }
  0xd8   : > { %1313 = vmatprep.subr.bf16.mxu0 %v1694_v3  ;;  %1519 = vmatprep.subr.bf16.mxu1 %v1694_v3  ;;  %v390_v24 = vld [vmem:[#allocation2 + $0x58] sm:$0xff]  ;;  %v380_v29 = vld [vmem:[#allocation2 + $0x8] sm:$0xff]  ;;  %v385_v41 = vld [vmem:[#allocation2 + $0x30] sm:$0xff]  ;;  %s2564_s22 = sld [smem:[#allocation28_spill]] (!%p1218_p10)  ;;  %s2565_s4 = sld [smem:[#allocation30_spill]] (!%p1218_p10) }
  0xd9   : > { %v388_v30 = vld [vmem:[#allocation2 + $0x48] sm:$0xff]  ;;  %v393_v42 = vld [vmem:[#allocation2 + $0x70] sm:$0xff]  ;;  %v383_v43 = vld [vmem:[#allocation2 + $0x20] sm:$0xff] }
  0xda   : > { %v391_v44 = vld [vmem:[#allocation2 + $0x60] sm:$0xff]  ;;  %v386_v47 = vld [vmem:[#allocation2 + $0x38] sm:$0xff]  ;;  %v384_v53 = vld [vmem:[#allocation2 + $0x28] sm:$0xff] }
  0xdb   : > { %1314 = vmatpush3.bf16.msra.mxu0 %v1694_v3  ;;  %1527 = vmatpush3.bf16.msra.mxu1 %v1694_v3  ;;  %v394_v48 = vld [vmem:[#allocation2 + $0x78] sm:$0xff]  ;;  %v392_v54 = vld [vmem:[#allocation2 + $0x68] sm:$0xff]  ;;  %v672_v1 = vld [vmem:[#allocation8] sm:$0xff] (!%p1218_p10) }
  0xdc   : > { %1315 = vmatprep.subr.bf16.mxu0 %v1695_v4  ;;  %1520 = vmatprep.subr.bf16.mxu1 %v1695_v4  ;;  %v673_v2 = vld [vmem:[#allocation8 + $0x8] sm:$0xff] (!%p1218_p10)  ;;  %v674_v3 = vld [vmem:[#allocation8 + $0x10] sm:$0xff] (!%p1218_p10)  ;;  %v675_v5 = vld [vmem:[#allocation8 + $0x18] sm:$0xff] (!%p1218_p10) }
  0xdd   : > { %v1457_v6 = vpack.c.bf16 (!%p1218_p10), %v675_v5, %v674_v3 }
  0xdf   : > { %1316 = vmatpush3.bf16.msra.mxu0 %v1695_v4  ;;  %1528 = vmatpush3.bf16.msra.mxu1 %v1695_v4  ;;  %v1453_v4 = vpack.c.bf16 (!%p1218_p10), %v673_v2, %v672_v1  ;;  %v1219_v1 = vld [vmem:[%s2564_s22] ss:$0 sm:$0xff] (!%p1218_p10) }
  0xe0   : > { %1317 = vmatprep.subr.bf16.mxu0 %v1696_v7  ;;  %1521 = vmatprep.subr.bf16.mxu1 %v1696_v7 }
  0xe3   : > { %1318 = vmatpush3.bf16.msra.mxu0 %v1696_v7  ;;  %1529 = vmatpush3.bf16.msra.mxu1 %v1696_v7  ;;  %v676_v7 = vld [vmem:[#allocation8 + $0x20] sm:$0xff] (!%p1218_p10) }
  0xe4   : > { %1319 = vmatprep.subr.bf16.mxu0 %v1697_v8  ;;  %1522 = vmatprep.subr.bf16.mxu1 %v1697_v8 }
  0xe7   : > { %1320 = vmatpush3.bf16.msra.mxu0 %v1697_v8  ;;  %1530 = vmatpush3.bf16.msra.mxu1 %v1697_v8  ;;  %v677_v8 = vld [vmem:[#allocation8 + $0x28] sm:$0xff] (!%p1218_p10) }
  0xe8   : > { %1321 = vmatprep.subr.bf16.mxu0 %v1698_v9  ;;  %1523 = vmatprep.subr.bf16.mxu1 %v1698_v9 }
  0xeb   : > { %1322 = vmatpush3.bf16.msra.mxu0 %v1698_v9  ;;  %1531 = vmatpush3.bf16.msra.mxu1 %v1698_v9  ;;  %v1461_v9 = vpack.c.bf16 (!%p1218_p10), %v677_v8, %v676_v7 }
  0xec   : > { %1323 = vmatprep.subr.bf16.mxu0 %v1699_v10  ;;  %1524 = vmatprep.subr.bf16.mxu1 %v1699_v10 }
  0xef   : > { %1324 = vmatpush3.bf16.msra.mxu0 %v1699_v10  ;;  %1532 = vmatpush3.bf16.msra.mxu1 %v1699_v10 }
  0xf0   : > { %1454 = vmatprep.subr.bf16.mxu0 (!%p1218_p10), %v1453_v4 }
  0xf2   : > { %1326 = vmatmul.mubr.bf16.vlgmr.msra.gmra.mrb[0].mxu0 %v1702_v11  ;;  %1334 = vmatmul.mubr.bf16.vlgmr.msra.gmra.mrb[0].mxu1 %v1703_v12  ;;  %v678_v11 = vld [vmem:[#allocation8 + $0x30] sm:$0xff] (!%p1218_p10)  ;;  %v679_v12 = vld [vmem:[#allocation8 + $0x38] sm:$0xff] (!%p1218_p10) }
  0xf3   : > { %1329 = vmatprep.mubr.bf16.mxu0 %v1704_v13  ;;  %1337 = vmatprep.mubr.bf16.mxu1 %v1705_v14  ;;  %v1465_v13 = vpack.c.bf16 (!%p1218_p10), %v679_v12, %v678_v11  ;;  %v680_v14 = vld [vmem:[#allocation8 + $0x40] sm:$0xff] (!%p1218_p10) }
  0xf4   : > { %1456 = vmatpush3.bf16.msra.mxu0 (!%p1218_p10), %v1453_v4 }
  0xf5   : > { %1458 = vmatprep.subr.bf16.mxu0 (!%p1218_p10), %v1457_v6 }
  0xf8   : > { %1460 = vmatpush3.bf16.msra.mxu0 (!%p1218_p10), %v1457_v6 }
  0xf9   : > { %1462 = vmatprep.subr.bf16.mxu0 (!%p1218_p10), %v1461_v9 }
  0xfa   : > { %1330 = vmatmul.mubr.bf16.gmra.mrb[4].mxu0 %v1706_v15  ;;  %1338 = vmatmul.mubr.bf16.gmra.mrb[4].mxu1 %v1707_v16  ;;  %v681_v15 = vld [vmem:[#allocation8 + $0x48] sm:$0xff] (!%p1218_p10)  ;;  %v856_v16 = vld [vmem:[#allocation9] sm:$0xff] (!%p1218_p10) }
  0xfc   : > { %1464 = vmatpush3.bf16.msra.mxu0 (!%p1218_p10), %v1461_v9 }
  0xfd   : > { %1466 = vmatprep.subr.bf16.mxu0 (!%p1218_p10), %v1465_v13 }
 0x100   : > { %1468 = vmatpush3.bf16.msra.mxu0 (!%p1218_p10), %v1465_v13 }
 0x1c5   : > { %v1327_v21 = vpop.f32.mrb[0].mxu0  ;;  %v1335_v22 = vpop.f32.mrb[0].mxu1 }
 0x1c6   : > { %v622_v25 = vadd.f32 %v1327_v21, %v381_v17  ;;  %v630_v26 = vadd.f32 %v1335_v22, %v389_v18  ;;  %v557_v27 = vpop.f32.mrb[1].mxu0  ;;  %v589_v28 = vpop.f32.mrb[1].mxu1  ;;  %v857_v17 = vld [vmem:[#allocation9 + $0x8] sm:$0xff] (!%p1218_p10)  ;;  %v858_v18 = vld [vmem:[#allocation9 + $0x10] sm:$0xff] (!%p1218_p10)  ;;  %v1469_v22 = vpack.c.bf16 (!%p1218_p10), %v681_v15, %v680_v14 }
 0x1c7   : > { %v620_v31 = vadd.f32 %v557_v27, %v379_v19  ;;  %v628_v32 = vadd.f32 %v589_v28, %v387_v20  ;;  %v1328_v33 = vpop.f32.mrb[2].mxu0  ;;  %v1336_v34 = vpop.f32.mrb[2].mxu1  ;;  %v859_v19 = vld [vmem:[#allocation9 + $0x18] sm:$0xff] (!%p1218_p10)  ;;  %v1485_v20 = vpack.c.bf16 (!%p1218_p10), %v857_v17, %v856_v16 }
 0x1c8   : > { %638 = vst [vmem:[#allocation2 + $0x10] sm:$0xff] %v622_v25  ;;  %646 = vst [vmem:[#allocation2 + $0x50] sm:$0xff] %v630_v26  ;;  %v623_v35 = vadd.f32 %v1328_v33, %v382_v23  ;;  %v631_v36 = vadd.f32 %v1336_v34, %v390_v24  ;;  %v560_v37 = vpop.f32.mrb[3].mxu0  ;;  %v592_v38 = vpop.f32.mrb[3].mxu1  ;;  %v1489_v21 = vpack.c.bf16 (!%p1218_p10), %v859_v19, %v858_v18  ;;  %v860_v23 = vld [vmem:[#allocation9 + $0x20] sm:$0xff] (!%p1218_p10)  ;;  %v861_v24 = vld [vmem:[#allocation9 + $0x28] sm:$0xff] (!%p1218_p10)  ;;  %1470 = vmatprep.subr.bf16.mxu0 (!%p1218_p10), %v1469_v22 }
 0x1c9   : > { %636 = vst [vmem:[#allocation2] sm:$0xff] %v620_v31  ;;  %644 = vst [vmem:[#allocation2 + $0x40] sm:$0xff] %v628_v32  ;;  %v621_v39 = vadd.f32 %v560_v37, %v380_v29  ;;  %v629_v40 = vadd.f32 %v592_v38, %v388_v30  ;;  %v682_v25 = vld [vmem:[#allocation8 + $0x50] sm:$0xff] (!%p1218_p10)  ;;  %v683_v26 = vld [vmem:[#allocation8 + $0x58] sm:$0xff] (!%p1218_p10)  ;;  %1486 = vmatprep.subr.bf16.mxu1 (!%p1218_p10), %v1485_v20  ;;  %v1493_v27 = vpack.c.bf16 (!%p1218_p10), %v861_v24, %v860_v23 }
 0x1ca   : > { %639 = vst [vmem:[#allocation2 + $0x18] sm:$0xff] %v623_v35  ;;  %647 = vst [vmem:[#allocation2 + $0x58] sm:$0xff] %v631_v36  ;;  %1488 = vmatpush3.bf16.msra.mxu1 (!%p1218_p10), %v1485_v20  ;;  %v1473_v28 = vpack.c.bf16 (!%p1218_p10), %v683_v26, %v682_v25  ;;  %v862_v29 = vld [vmem:[#allocation9 + $0x30] sm:$0xff] (!%p1218_p10)  ;;  %v863_v30 = vld [vmem:[#allocation9 + $0x38] sm:$0xff] (!%p1218_p10)  ;;  %1472 = vmatpush3.bf16.msra.mxu0 (!%p1218_p10), %v1469_v22 }
 0x1cb   : > { %637 = vst [vmem:[#allocation2 + $0x8] sm:$0xff] %v621_v39  ;;  %645 = vst [vmem:[#allocation2 + $0x48] sm:$0xff] %v629_v40  ;;  %1490 = vmatprep.subr.bf16.mxu1 (!%p1218_p10), %v1489_v21  ;;  %v684_v31 = vld [vmem:[#allocation8 + $0x60] sm:$0xff] (!%p1218_p10)  ;;  %v685_v32 = vld [vmem:[#allocation8 + $0x68] sm:$0xff] (!%p1218_p10)  ;;  %v1497_v33 = vpack.c.bf16 (!%p1218_p10), %v863_v30, %v862_v29 }
 0x1cc   : > { %1474 = vmatprep.subr.bf16.mxu0 (!%p1218_p10), %v1473_v28  ;;  %v1477_v34 = vpack.c.bf16 (!%p1218_p10), %v685_v32, %v684_v31  ;;  %v864_v35 = vld [vmem:[#allocation9 + $0x40] sm:$0xff] (!%p1218_p10)  ;;  %v865_v36 = vld [vmem:[#allocation9 + $0x48] sm:$0xff] (!%p1218_p10)  ;;  %v686_v37 = vld [vmem:[#allocation8 + $0x70] sm:$0xff] (!%p1218_p10) }
 0x1cd   : > { %v1331_v45 = vpop.f32.mrb[4].mxu0  ;;  %v1339_v46 = vpop.f32.mrb[4].mxu1  ;;  %655 = sbr.rel (%p1218_p10) target bundleno = 935 (0x3a7), region = 68  ;;  %v687_v38 = vld [vmem:[#allocation8 + $0x78] sm:$0xff] (!%p1218_p10)  ;;  %v1501_v39 = vpack.c.bf16 (!%p1218_p10), %v865_v36, %v864_v35 }
 0x1ce   : > { %v626_v49 = vadd.f32 %v1331_v45, %v385_v41  ;;  %v634_v50 = vadd.f32 %v1339_v46, %v393_v42  ;;  %v573_v51 = vpop.f32.mrb[5].mxu0  ;;  %v605_v52 = vpop.f32.mrb[5].mxu1  ;;  %1492 = vmatpush3.bf16.msra.mxu1 (!%p1218_p10), %v1489_v21  ;;  %1476 = vmatpush3.bf16.msra.mxu0 (!%p1218_p10), %v1473_v28  ;;  %v1481_v40 = vpack.c.bf16 (!%p1218_p10), %v687_v38, %v686_v37  ;;  %v866_v41 = vld [vmem:[#allocation9 + $0x50] sm:$0xff] (!%p1218_p10)  ;;  %v867_v42 = vld [vmem:[#allocation9 + $0x58] sm:$0xff] (!%p1218_p10)  ;;  %v869_v45 = vld [vmem:[#allocation9 + $0x68] sm:$0xff] (!%p1218_p10) }
 0x1cf   : > { %v624_v55 = vadd.f32 %v573_v51, %v383_v43  ;;  %v632_v56 = vadd.f32 %v605_v52, %v391_v44  ;;  %v1332_v57 = vpop.f32.mrb[6].mxu0  ;;  %v1340_v58 = vpop.f32.mrb[6].mxu1  ;;  %1494 = vmatprep.subr.bf16.mxu1 (!%p1218_p10), %v1493_v27  ;;  %1478 = vmatprep.subr.bf16.mxu0 (!%p1218_p10), %v1477_v34  ;;  %v1505_v43 = vpack.c.bf16 (!%p1218_p10), %v867_v42, %v866_v41  ;;  %v868_v44 = vld [vmem:[#allocation9 + $0x60] sm:$0xff] (!%p1218_p10) }
 0x1d0   : > { %642 = vst [vmem:[#allocation2 + $0x30] sm:$0xff] %v626_v49  ;;  %650 = vst [vmem:[#allocation2 + $0x70] sm:$0xff] %v634_v50  ;;  %v627_v59 = vadd.f32 %v1332_v57, %v386_v47  ;;  %v635_v60 = vadd.f32 %v1340_v58, %v394_v48  ;;  %v576_v61 = vpop.f32.mrb[7].mxu0  ;;  %v608_v62 = vpop.f32.mrb[7].mxu1  ;;  %v656_v10 = vld [vmem:[#allocation2] sm:$0xff] (!%p1218_p10)  ;;  %v1509_v47 = vpack.c.bf16 (!%p1218_p10), %v869_v45, %v868_v44  ;;  %v658_v48 = vld [vmem:[#allocation2 + $0x10] sm:$0xff] (!%p1218_p10) }
 0x1d1   : > { %640 = vst [vmem:[#allocation2 + $0x20] sm:$0xff] %v624_v55  ;;  %648 = vst [vmem:[#allocation2 + $0x60] sm:$0xff] %v632_v56  ;;  %v625_v63 = vadd.f32 %v576_v61, %v384_v53  ;;  %v633_v0 = vadd.f32 %v608_v62, %v392_v54  ;;  %1373 = vmatprep.mubr.f32.mxu0 (!%p1218_p10), %v656_v10  ;;  %v659_v49 = vld [vmem:[#allocation2 + $0x18] sm:$0xff] (!%p1218_p10)  ;;  %v664_v54 = vld [vmem:[#allocation2 + $0x40] sm:$0xff] (!%p1218_p10) }
 0x1d2   : > { %643 = vst [vmem:[#allocation2 + $0x38] sm:$0xff] %v627_v59  ;;  %651 = vst [vmem:[#allocation2 + $0x78] sm:$0xff] %v635_v60  ;;  %1496 = vmatpush3.bf16.msra.mxu1 (!%p1218_p10), %v1493_v27  ;;  %1480 = vmatpush3.bf16.msra.mxu0 (!%p1218_p10), %v1477_v34  ;;  %v657_v46 = vld [vmem:[#allocation2 + $0x8] sm:$0xff] (!%p1218_p10)  ;;  %v666_v56 = vld [vmem:[#allocation2 + $0x50] sm:$0xff] (!%p1218_p10) }
 0x1d3   : > { %641 = vst [vmem:[#allocation2 + $0x28] sm:$0xff] %v625_v63  ;;  %649 = vst [vmem:[#allocation2 + $0x68] sm:$0xff] %v633_v0  ;;  %1498 = vmatprep.subr.bf16.mxu1 (!%p1218_p10), %v1497_v33  ;;  %1482 = vmatprep.subr.bf16.mxu0 (!%p1218_p10), %v1481_v40  ;;  %v665_v55 = vld [vmem:[#allocation2 + $0x48] sm:$0xff] (!%p1218_p10)  ;;  %v667_v57 = vld [vmem:[#allocation2 + $0x58] sm:$0xff] (!%p1218_p10) }
 0x1d4   : > { %v870_v62 = vld [vmem:[#allocation9 + $0x70] sm:$0xff]  ;;  %v871_v63 = vld [vmem:[#allocation9 + $0x78] sm:$0xff] }
 0x1d5   : > { %v1513_v0 = vpack.c.bf16 %v871_v63, %v870_v62 }
 0x1d6   : > { %1500 = vmatpush3.bf16.msra.mxu1 %v1497_v33  ;;  %1484 = vmatpush3.bf16.msra.mxu0 %v1481_v40 }
 0x1d7   : > { %1502 = vmatprep.subr.bf16.mxu1 %v1501_v39  ;;  %v662_v52 = vld [vmem:[#allocation2 + $0x30] sm:$0xff] }
 0x1d8   : > { %v660_v50 = vld [vmem:[#allocation2 + $0x20] sm:$0xff]  ;;  %v670_v60 = vld [vmem:[#allocation2 + $0x70] sm:$0xff] }
 0x1d9   : > { %1374 = vmatmul.mubr.f32.vlgmr.msra.gmra.mrb[0].mxu0 %v657_v46  ;;  %v663_v53 = vld [vmem:[#allocation2 + $0x38] sm:$0xff]  ;;  %v668_v58 = vld [vmem:[#allocation2 + $0x60] sm:$0xff] }
 0x1da   : > { %1504 = vmatpush3.bf16.msra.mxu1 %v1501_v39  ;;  %1376 = vmatprep.mubr.f32.mxu0 %v658_v48  ;;  %v661_v51 = vld [vmem:[#allocation2 + $0x28] sm:$0xff]  ;;  %v671_v61 = vld [vmem:[#allocation2 + $0x78] sm:$0xff] }
 0x1db   : > { %1506 = vmatprep.subr.bf16.mxu1 %v1505_v43  ;;  %v669_v59 = vld [vmem:[#allocation2 + $0x68] sm:$0xff] }
 0x1dd   : > { %1377 = vmatmul.mubr.f32.gmra.mrb[2].mxu0 %v659_v49 }
 0x1de   : > { %1508 = vmatpush3.bf16.msra.mxu1 %v1505_v43  ;;  %1379 = vmatprep.mubr.f32.mxu0 %v660_v50  ;;  %v1220_v50 = vld [vmem:[%s2565_s4] ss:$0 sm:$0xff] }
 0x1df   : > { %1510 = vmatprep.subr.bf16.mxu1 %v1509_v47 }
 0x1e1   : > { %1380 = vmatmul.mubr.f32.gmra.mrb[4].mxu0 %v661_v51 }
 0x1e2   : > { %1512 = vmatpush3.bf16.msra.mxu1 %v1509_v47  ;;  %1382 = vmatprep.mubr.f32.mxu0 %v662_v52 }
 0x1e3   : > { %1514 = vmatprep.subr.bf16.mxu1 %v1513_v0 }
 0x1e5   : > { %1383 = vmatmul.mubr.f32.gmra.mrb[6].mxu0 %v663_v53 }
 0x1e6   : > { %1385 = vmatprep.mubr.f32.mxu0 %v664_v54  ;;  %1516 = vmatpush3.bf16.msra.mxu1 %v1513_v0 }
 0x1e9   : > { %1386 = vmatmul.mubr.f32.gmra.mrb[8].mxu0 %v665_v55 }
 0x1ea   : > { %1388 = vmatprep.mubr.f32.mxu0 %v666_v56 }
 0x1ed   : > { %1389 = vmatmul.mubr.f32.gmra.mrb[10].mxu0 %v667_v57 }
 0x1ee   : > { %1391 = vmatprep.mubr.f32.mxu0 %v668_v58 }
 0x1f1   : > { %1392 = vmatmul.mubr.f32.gmra.mrb[12].mxu0 %v669_v59 }
 0x1f2   : > { %1394 = vmatprep.mubr.f32.mxu0 %v670_v60 }
 0x1f5   : > { %1395 = vmatmul.mubr.f32.gmra.mrb[14].mxu0 %v671_v61 }
 0x2ac   : > { %v1375_v2 = vpop.f32.mrb[0].mxu0 }
 0x2ad   : > { %v767_v3 = vadd.f32 %v1375_v2, %v1219_v1  ;;  %v761_v4 = vpop.f32.mrb[1].mxu0 }
 0x2ae   : > { %v762_v5 = vadd.f32 %v1219_v1, %v761_v4 }
 0x2af   : > { %v841_v8 = vmax.f32 %v767_v3, 0.0 }
 0x2b0   : > { %v1378_v6 = vpop.f32.mrb[2].mxu0  ;;  %v840_v7 = vmax.f32 %v762_v5, 0.0 }
 0x2b1   : > { %v777_v9 = vadd.f32 %v1378_v6, %v1219_v1  ;;  %v771_v10 = vpop.f32.mrb[3].mxu0 }
 0x2b2   : > { %v772_v11 = vadd.f32 %v1219_v1, %v771_v10  ;;  %1429 = vmatprep.mubr.f32.mxu1 %v840_v7 }
 0x2b3   : > { %1430 = vmatmul.mubr.f32.vlgmr.msra.gmra.mrb[0].mxu1 %v841_v8  ;;  %v843_v14 = vmax.f32 %v777_v9, 0.0 }
 0x2b4   : > { %v842_v12 = vmax.f32 %v772_v11, 0.0  ;;  %v1381_v13 = vpop.f32.mrb[4].mxu0 }
 0x2b5   : > { %v787_v15 = vadd.f32 %v1381_v13, %v1219_v1  ;;  %v781_v16 = vpop.f32.mrb[5].mxu0 }
 0x2b6   : > { %v782_v17 = vadd.f32 %v1219_v1, %v781_v16  ;;  %1432 = vmatprep.mubr.f32.mxu1 %v842_v12 }
 0x2b7   : > { %1433 = vmatmul.mubr.f32.gmra.mrb[2].mxu1 %v843_v14  ;;  %v845_v20 = vmax.f32 %v787_v15, 0.0 }
 0x2b8   : > { %v844_v18 = vmax.f32 %v782_v17, 0.0  ;;  %v1384_v19 = vpop.f32.mrb[6].mxu0 }
 0x2b9   : > { %v797_v21 = vadd.f32 %v1384_v19, %v1219_v1  ;;  %v791_v22 = vpop.f32.mrb[7].mxu0 }
 0x2ba   : > { %v792_v23 = vadd.f32 %v1219_v1, %v791_v22  ;;  %1435 = vmatprep.mubr.f32.mxu1 %v844_v18 }
 0x2bb   : > { %1436 = vmatmul.mubr.f32.gmra.mrb[4].mxu1 %v845_v20  ;;  %v847_v26 = vmax.f32 %v797_v21, 0.0 }
 0x2bc   : > { %v846_v24 = vmax.f32 %v792_v23, 0.0  ;;  %v1387_v25 = vpop.f32.mrb[8].mxu0 }
 0x2bd   : > { %v807_v27 = vadd.f32 %v1387_v25, %v1219_v1  ;;  %v801_v28 = vpop.f32.mrb[9].mxu0 }
 0x2be   : > { %v802_v29 = vadd.f32 %v1219_v1, %v801_v28  ;;  %1438 = vmatprep.mubr.f32.mxu1 %v846_v24 }
 0x2bf   : > { %1439 = vmatmul.mubr.f32.gmra.mrb[6].mxu1 %v847_v26  ;;  %v849_v32 = vmax.f32 %v807_v27, 0.0 }
 0x2c0   : > { %v848_v30 = vmax.f32 %v802_v29, 0.0  ;;  %v1390_v31 = vpop.f32.mrb[10].mxu0 }
 0x2c1   : > { %v817_v33 = vadd.f32 %v1390_v31, %v1219_v1  ;;  %v811_v34 = vpop.f32.mrb[11].mxu0 }
 0x2c2   : > { %v812_v35 = vadd.f32 %v1219_v1, %v811_v34  ;;  %1441 = vmatprep.mubr.f32.mxu1 %v848_v30 }
 0x2c3   : > { %1442 = vmatmul.mubr.f32.gmra.mrb[8].mxu1 %v849_v32  ;;  %v851_v38 = vmax.f32 %v817_v33, 0.0 }
 0x2c4   : > { %v850_v36 = vmax.f32 %v812_v35, 0.0  ;;  %v1393_v37 = vpop.f32.mrb[12].mxu0 }
 0x2c5   : > { %v827_v39 = vadd.f32 %v1393_v37, %v1219_v1  ;;  %v821_v40 = vpop.f32.mrb[13].mxu0 }
 0x2c6   : > { %v822_v41 = vadd.f32 %v1219_v1, %v821_v40  ;;  %1444 = vmatprep.mubr.f32.mxu1 %v850_v36 }
 0x2c7   : > { %1445 = vmatmul.mubr.f32.gmra.mrb[10].mxu1 %v851_v38  ;;  %v853_v44 = vmax.f32 %v827_v39, 0.0 }
 0x2c8   : > { %v852_v42 = vmax.f32 %v822_v41, 0.0  ;;  %v1396_v43 = vpop.f32.mrb[14].mxu0 }
 0x2c9   : > { %v837_v45 = vadd.f32 %v1396_v43, %v1219_v1  ;;  %v831_v46 = vpop.f32.mrb[15].mxu0 }
 0x2ca   : > { %v832_v47 = vadd.f32 %v1219_v1, %v831_v46  ;;  %1447 = vmatprep.mubr.f32.mxu1 %v852_v42 }
 0x2cb   : > { %1448 = vmatmul.mubr.f32.gmra.mrb[12].mxu1 %v853_v44  ;;  %v855_v49 = vmax.f32 %v837_v45, 0.0 }
 0x2cc   : > { %v854_v48 = vmax.f32 %v832_v47, 0.0 }
 0x2ce   : > { %1450 = vmatprep.mubr.f32.mxu1 %v854_v48 }
 0x2cf   : > { %1451 = vmatmul.mubr.f32.gmra.mrb[14].mxu1 %v855_v49 }
 0x386   : > { %v1431_v51 = vpop.f32.mrb[0].mxu1 }
 0x387   : > { %v951_v52 = vadd.f32 %v1431_v51, %v1220_v50  ;;  %v945_v53 = vpop.f32.mrb[1].mxu1 }
 0x388   : > { %v946_v54 = vadd.f32 %v1220_v50, %v945_v53 }
 0x389   : > { %1025 = vst [vmem:[%s2365_s15 + $0x8] sm:$0xff] %v951_v52 }
 0x38a   : > { %1024 = vst [vmem:[%s2365_s15] sm:$0xff] %v946_v54  ;;  %v1434_v55 = vpop.f32.mrb[2].mxu1 }
 0x38b   : > { %v961_v56 = vadd.f32 %v1434_v55, %v1220_v50  ;;  %v955_v57 = vpop.f32.mrb[3].mxu1 }
 0x38c   : > { %v956_v58 = vadd.f32 %v1220_v50, %v955_v57 }
 0x38d   : > { %1027 = vst [vmem:[%s2365_s15 + $0x18] sm:$0xff] %v961_v56 }
 0x38e   : > { %1026 = vst [vmem:[%s2365_s15 + $0x10] sm:$0xff] %v956_v58  ;;  %v1437_v59 = vpop.f32.mrb[4].mxu1 }
 0x38f   : > { %v971_v60 = vadd.f32 %v1437_v59, %v1220_v50  ;;  %v965_v61 = vpop.f32.mrb[5].mxu1 }
 0x390   : > { %v966_v62 = vadd.f32 %v1220_v50, %v965_v61 }
 0x391   : > { %1029 = vst [vmem:[%s2365_s15 + $0x28] sm:$0xff] %v971_v60 }
 0x392   : > { %1028 = vst [vmem:[%s2365_s15 + $0x20] sm:$0xff] %v966_v62  ;;  %v1440_v63 = vpop.f32.mrb[6].mxu1 }
 0x393   : > { %v981_v0 = vadd.f32 %v1440_v63, %v1220_v50  ;;  %v975_v1 = vpop.f32.mrb[7].mxu1 }
 0x394   : > { %v976_v2 = vadd.f32 %v1220_v50, %v975_v1 }
 0x395   : > { %1031 = vst [vmem:[%s2365_s15 + $0x38] sm:$0xff] %v981_v0 }
 0x396   : > { %1030 = vst [vmem:[%s2365_s15 + $0x30] sm:$0xff] %v976_v2  ;;  %v1443_v3 = vpop.f32.mrb[8].mxu1 }
 0x397   : > { %v991_v4 = vadd.f32 %v1443_v3, %v1220_v50  ;;  %v985_v5 = vpop.f32.mrb[9].mxu1 }
 0x398   : > { %v986_v6 = vadd.f32 %v1220_v50, %v985_v5 }
 0x399   : > { %1033 = vst [vmem:[%s2365_s15 + $0x48] sm:$0xff] %v991_v4 }
 0x39a   : > { %1032 = vst [vmem:[%s2365_s15 + $0x40] sm:$0xff] %v986_v6  ;;  %v1446_v7 = vpop.f32.mrb[10].mxu1 }
 0x39b   : > { %v1001_v8 = vadd.f32 %v1446_v7, %v1220_v50  ;;  %v995_v9 = vpop.f32.mrb[11].mxu1 }
 0x39c   : > { %v996_v10 = vadd.f32 %v1220_v50, %v995_v9 }
 0x39d   : > { %1035 = vst [vmem:[%s2365_s15 + $0x58] sm:$0xff] %v1001_v8 }
 0x39e   : > { %1034 = vst [vmem:[%s2365_s15 + $0x50] sm:$0xff] %v996_v10  ;;  %v1449_v11 = vpop.f32.mrb[12].mxu1 }
 0x39f   : > { %v1011_v12 = vadd.f32 %v1449_v11, %v1220_v50  ;;  %v1005_v13 = vpop.f32.mrb[13].mxu1 }
 0x3a0   : > { %v1006_v14 = vadd.f32 %v1220_v50, %v1005_v13 }
 0x3a1   : > { %1037 = vst [vmem:[%s2365_s15 + $0x68] sm:$0xff] %v1011_v12 }
 0x3a2   : > { %1036 = vst [vmem:[%s2365_s15 + $0x60] sm:$0xff] %v1006_v14  ;;  %v1452_v15 = vpop.f32.mrb[14].mxu1 }
 0x3a3   : > { %v1021_v16 = vadd.f32 %v1452_v15, %v1220_v50  ;;  %v1015_v17 = vpop.f32.mrb[15].mxu1 }
 0x3a4   : > { %v1016_v18 = vadd.f32 %v1220_v50, %v1015_v17 }
 0x3a5   : > { %1039 = vst [vmem:[%s2365_s15 + $0x78] sm:$0xff] %v1021_v16 }
 0x3a6   : > { %1038 = vst [vmem:[%s2365_s15 + $0x70] sm:$0xff] %v1016_v18 }
 0x3a7 PF: > { %s2566_s13 = sld [smem:[#allocation20_spill]]  ;;  %s2568_s0 = sld [smem:[#allocation23_spill]] }
 0x3a8   : > { %s2569_s14 = sld [smem:[#allocation31_spill]]  ;;  %s1054_s17 = sshll.u32 %s2365_s15, 4  ;;  %s2414_s17 = int_to_ptr.vmem [resolvable:$true] %s1054_s17 }
 0x3a9   : > { %s2418_s27 = scalar_lea.sflag [#allocation5], %s352_s7  ;;  %s1824_s11 = scalar_lea.vmem %s2414_s17, 2048 }
 0x3aa   : > { %p1825_p0 = scmp.ne.s32.totalorder %s2414_s17, %s1824_s11  ;;  %s1993_s2 = smov [#allocation11]  }
 0x3ab   : > { %s1828_s22 = sshll.u32 %s1993_s2, 4  ;;  %s1829_s22 = int_to_ptr.vmem [resolvable:$false] %s1828_s22 }
 0x3ac   : > { %s1830_s30 = scalar_lea.vmem %s1829_s22, 4096  ;;  %p1831_p12 = scmp.lt.s32.totalorder %s2414_s17, %s1829_s22 }
 0x3ad   : > { %s1228_s20 = sshll.u32 %s2566_s13, 11  ;;  %p2570_p9 = scmp.ne.s32.totalorder %s2568_s0, 0 }
 0x3ae   : > { %s2411_s21 = scalar_lea.hbm %s2569_s14, %s1228_s20  ;;  %p1832_p5 = scmp.lt.s32.totalorder %s1830_s30, %s1824_s11 }
 0x3af   : > { %p1826_p13 = pnand %p1825_p0, %p2570_p9 }
 0x3b0   : > { %p1833_p4 = por %p1832_p5, %p1831_p12 }
 0x3b1   : > { %p1827_p8 = pneg %p1826_p13 }
 0x3b3   : > { %p1834_p7 = pnand %p1833_p4, %p1827_p8 }
 0x3b5   : > { %1837 = shalt.err (!%p1834_p7)
}
 0x3b6   : > { %s1838_s7 = scalar_lea.hbm %s2411_s21, 2048  ;;  %s1842_s4 = scalar_lea.hbm %s2569_s14, 4096 }
 0x3b7   : > { %p1839_p6 = scmp.ne.s32.totalorder %s2411_s21, %s1838_s7  ;;  %p1843_p3 = scmp.lt.u32.totalorder %s2411_s21, %s2569_s14 }
 0x3b8   : > { %p1844_p11 = scmp.lt.u32.totalorder %s1842_s4, %s1838_s7  ;;  %p1846_p0 = scmp.lt.u32.totalorder %s1838_s7, %s2411_s21 }
 0x3b9   : > { %p1840_p1 = pnand %p1839_p6, %p2570_p9 }
 0x3ba   : > { %p1845_p10 = por %p1844_p11, %p1843_p3 }
 0x3bb   : > { %p1841_p2 = pneg %p1840_p1 }
 0x3bc   : > { %p1847_p13 = por %p1846_p0, %p1845_p10 }
 0x3be   : > { %p1848_p8 = pnand %p1847_p13, %p1841_p2 }
 0x3c0   : > { %1851 = shalt.err (!%p1848_p8)
}
 0x3c1   : > { %s1994_s20 = smov 128   ;;  %s1995_s18 = smov 8  }
 0x3c2   : > { %1545 = dma.vmem_to_hbm [thread:$0]  (%p2570_p9), %s2414_s17, 2048, %s2411_s21, %s2418_s27, %s1994_s20, %s1994_s20, %s1995_s18  }
 0x3c3 PF: > { %s2571_s6 = sld [smem:[#allocation17_spill]]  ;;  %s2572_s11 = sld [smem:[#allocation24_spill]] }
 0x3c4   : > { %p1570_p12 = scmp.ge.s32.totalorder %s1982_s10, 2 }
 0x3c9   : > { %s1069_s2 = sand.u32 1, %s2571_s6   ;;  %p2573_p5 = scmp.ne.s32.totalorder %s2572_s11, 0 }
 0x3ca   : > { %s1070_s22 = scalar_lea.sflag [#allocation5], %s1069_s2 }
 0x3cb   : > { %p1562_p4 = pnand %p1570_p12, %p2573_p5 }
 0x3cd   : > { %1925 = dma.done.wait (!%p1562_p4), %s1070_s22, 2048  }
 0x3ce   : > { %1927 = vsyncadd (!%p1562_p4), %s1070_s22, 4294965248  ;;  %s26_s10 = sadd.s32 1, %s1982_s10   ;;  %s2575_s21 = sld [smem:[#allocation18_spill]] }
 0x3cf   : > { %p2447_p7 = scmp.ge.s32.totalorder %s26_s10, 6   ;;  %s2576_s0 = sld [smem:[#allocation25_spill]] }
 0x3d0   : > { %s2577_s17 = smov %s2596_s24  ;;  %s2579_s22 = smov %s1938_s23 }
 0x3d1   : > { %s2580_s23 = smov %s2228_s3  ;;  %s2581_s24 = smov %s1946_s25 }
 0x3d2   : > { %s2582_s25 = smov %s1950_s26  ;;  %s2583_s26 = smov %s2287_s12 }
 0x3d3   : > { %s2584_s27 = smov %s1958_s28  ;;  %s2585_s28 = smov %s1962_s29 }
 0x3d4   : > { %s2586_s29 = smov %s2231_s5  ;;  %s2587_s30 = smov %s1974_s8 }
 0x3d5   : > { %s2588_s7 = smov %s1978_s9  ;;  %s2589_s8 = smov %s2576_s0 }
 0x3d6   : > { %s2590_s9 = smov %s2577_s17  ;;  %25 = sbr.rel (!%p2447_p7) target bundleno = 20 (0x14), region = 118 }
 0x3dd   :  { %1075 = vsyncpa [#allocation4], 1 }
 0x3de   :  { %1077 = vsyncpa [#allocation4 + $0x1], 1 }
 0x3df   :  { %1078 = vsyncpa [#allocation7], 1 }
 0x3e0   :  { %1080 = vsyncpa [#allocation7 + $0x1], 1 }
 0x3e1   :  { %1081 = vsyncpa [#allocation10], 1 }
 0x3e2   :  { %1082 = vsyncpa [#allocation5], 1 }
 0x3e3   :  { %1084 = vsyncpa [#allocation5 + $0x1], 1 }

</bundles_post_ra>
